<compile_context>
chip_gen: v7x
topology: tpu7x:2x2x1
jax: 0.10.0
libtpu: 0.0.40
codegen_flags: <defaults>
</compile_context>

<pallas_src>
import functools

import jax
import jax.numpy as jnp
from jax.experimental import pallas as pl
from jax.experimental.pallas import tpu as pltpu

LANE = 128
SUBLANE = 8


def _round_up(x, m):
    return (x + m - 1) // m * m


def _tpu_info():
    """(vmem_capacity_bytes, num_tensorcores_per_chip) with safe fallbacks."""
    kind = ""
    try:
        kind = jax.devices()[0].device_kind.lower()
    except Exception:
        pass
    is_v7 = "v7" in kind
    try:
        vmem = int(pltpu.get_tpu_info().vmem_capacity_bytes)
    except Exception:
        vmem = (64 << 20) if is_v7 else (128 << 20)
    num_tc = 2 if is_v7 else 1
    return vmem, num_tc


def _resident_spec(shape):
    """Constant-index block (fetched once).  Single-buffer to halve VMEM."""
    if hasattr(pl, "Buffered"):
        return pl.BlockSpec(shape, lambda i: (0, 0), pipeline_mode=pl.Buffered(1))
    return pl.BlockSpec(shape, lambda i: (0, 0))


# ----------------------------- Pallas kernel -------------------------------

def _fused_net_kernel(*refs, acts):
    """Fully fused forward.

    refs = (x_ref, w0_ref, b0_ref, w1_ref, b1_ref, ..., o_ref)
    x:[tm, D0p] bf16   w_i:[Kp_i, Np_i] bf16 (pre-transposed)
    b_i:[1, Np_i] f32  o:[tm, Doutp] f32
    """
    x_ref = refs[0]
    o_ref = refs[-1]
    wb = refs[1:-1]

    h = x_ref[...]                                            # bf16
    n_layers = len(acts)
    for i, act in enumerate(acts):
        w = wb[2 * i][...]                                    # bf16
        b = wb[2 * i + 1][...]                                # f32
        acc = jnp.dot(h, w, preferred_element_type=jnp.float32) + b
        if act == "tanh":
            acc = jnp.tanh(acc)
        elif act == "relu":
            acc = jnp.maximum(acc, 0.0)
        elif act != "none":
            raise ValueError(act)
        if i + 1 < n_layers:
            h = acc.astype(jnp.bfloat16)                      # bf16 into next MXU pass
        else:
            o_ref[...] = acc.astype(o_ref.dtype)              # lane-dense f32 store


# ------------------------------- forward -----------------------------------

@functools.partial(jax.jit, static_argnames=("acts", "output_dim"))
def fused_forward(x, weights, biases, acts, output_dim):
    """x:[batch, input_dim] -> [batch, output_dim].

    weights[i]: [Kp_i, Np_i] bfloat16, pre-transposed & zero-padded.
    biases[i]:  [1, Np_i]    float32, zero-padded.
    acts: tuple of "tanh"/"relu"/"none", one per layer (static).
    """
    batch, in_dim = x.shape
    in_pad = weights[0].shape[0]
    out_pad = weights[-1].shape[1]
    max_np = max(w.shape[1] for w in weights)

    vmem_cap, num_tc = _tpu_info()
    budget = int(vmem_cap * 0.75)        # headroom for compiler scratch / spill

    weight_bytes = sum(w.size * w.dtype.itemsize + b.size * b.dtype.itemsize
                       for w, b in zip(weights, biases))

    if weight_bytes > budget:
        # TODO(synk): weights too large to keep VMEM-resident; should stream
        # per-layer weight tiles (emit_pipeline / manual make_async_copy from
        # pl.ANY).  Plain-JAX fallback keeps the forward correct meanwhile.
        h = x.astype(jnp.bfloat16)
        hf = h.astype(jnp.float32)
        for w, b, act in zip(weights, biases, acts):
            hf = jnp.dot(h, w, preferred_element_type=jnp.float32) + b
            if act == "tanh":
                hf = jnp.tanh(hf)
            elif act == "relu":
                hf = jnp.maximum(hf, 0.0)
            h = hf.astype(jnp.bfloat16)
        return hf[:batch, :output_dim].astype(x.dtype)

    m8 = _round_up(max(batch, SUBLANE), SUBLANE)

    # Batch tile: bound pad waste (256-row cap on v7x, 512 on v5e/v6e) and,
    # on multi-TensorCore chips, ensure >= 2 grid steps so the "parallel"
    # batch axis can be sharded across cores.
    tm_cap = 256 if num_tc > 1 else 512
    tm = min(m8, tm_cap)
    if num_tc > 1 and m8 > SUBLANE:
        tm = min(tm, _round_up((m8 + num_tc - 1) // num_tc, SUBLANE))

    def _resident_bytes(tile_m):
        io = 2 * tile_m * in_pad * 2 + 2 * tile_m * out_pad * 4   # dbl-buffered x / out
        work = 2 * tile_m * max_np * 4                            # f32 working activations
        return weight_bytes + io + work

    while tm > SUBLANE and _resident_bytes(tm) > budget:
        tm = _round_up(tm // 2, SUBLANE)

    m_pad = _round_up(m8, tm)
    grid = (m_pad // tm,)

    # Build the padded bf16 input exactly once at its final shape.
    x_p = jnp.zeros((m_pad, in_pad), jnp.bfloat16)
    x_p = x_p.at[:batch, :in_dim].set(x.astype(jnp.bfloat16))

    in_specs = [pl.BlockSpec((tm, in_pad), lambda i: (i, 0))]
    flat_wb = []
    flops = 0
    transcendentals = 0
    for w, b, act in zip(weights, biases, acts):
        in_specs.append(_resident_spec(w.shape))
        in_specs.append(_resident_spec(b.shape))
        flat_wb.extend([w, b])
        flops += 2 * m_pad * w.shape[0] * w.shape[1]
        if act == "tanh":
            transcendentals += m_pad * w.shape[1]

    bytes_accessed = (x_p.size * 2
                      + sum(a.size * a.dtype.itemsize for a in flat_wb)
                      + m_pad * out_pad * 4)

    vmem_limit = int(min(budget, max(2 * _resident_bytes(tm), 32 << 20)))

    out = pl.pallas_call(
        functools.partial(_fused_net_kernel, acts=acts),
        out_shape=jax.ShapeDtypeStruct((m_pad, out_pad), jnp.float32),
        grid=grid,
        in_specs=in_specs,
        out_specs=pl.BlockSpec((tm, out_pad), lambda i: (i, 0)),
        compiler_params=pltpu.CompilerParams(
            dimension_semantics=("parallel",),      # megacore sharding on v7x
            vmem_limit_bytes=vmem_limit,
        ),
        cost_estimate=pl.CostEstimate(
            flops=flops,
            transcendentals=transcendentals,
            bytes_accessed=int(bytes_accessed),
        ),
    )(x_p, *flat_wb)

    return out[:batch, :output_dim].astype(x.dtype)


# --------------------------- parameter creation -----------------------------

def make_params(key, input_dim, reservoir_sizes, mlp_hidden_dims, output_dim):
    """Logical (unpadded, torch-layout [out, in]) parameters + activations."""
    layers = []   # list of (w[out,in], b[out], act)
    prev = input_dim
    for n in reservoir_sizes:
        key, k1 = jax.random.split(key)
        w = jax.random.uniform(k1, (n, prev), jnp.float32, -1.0, 1.0) * 0.5
        b = jnp.zeros((n,), jnp.float32)
        layers.append((w, b, "tanh"))
        prev = n

    dims = [prev] + list(mlp_hidden_dims) + [output_dim]
    for i in range(len(dims) - 1):
        fan_in, fan_out = dims[i], dims[i + 1]
        bound = 1.0 / float(jnp.sqrt(jnp.float32(fan_in)))
        key, k1, k2 = jax.random.split(key, 3)
        w = jax.random.uniform(k1, (fan_out, fan_in), jnp.float32, -bound, bound)
        b = jax.random.uniform(k2, (fan_out,), jnp.float32, -bound, bound)
        act = "relu" if i < len(dims) - 2 else "none"
        layers.append((w, b, act))
    return layers


def prepare_params(layers):
    """Pre-transpose ([out,in] -> [in,out]), zero-pad lane-dense, cast bf16.

    Done once at init so the jitted forward has no transposes/relayouts and
    feeds the MXU with bf16 weights (f32 accumulation happens in-kernel).
    """
    weights, biases, acts = [], [], []
    for (w, b, act) in layers:
        out_d, in_d = w.shape
        k_pad = _round_up(in_d, LANE)
        n_pad = _round_up(out_d, LANE)
        w_t = jnp.zeros((k_pad, n_pad), jnp.float32).at[:in_d, :out_d].set(w.T)
        b_p = jnp.zeros((1, n_pad), jnp.float32).at[0, :out_d].set(b)
        weights.append(w_t.astype(jnp.bfloat16))
        biases.append(b_p)
        acts.append(act)
    return weights, biases, tuple(acts)


# --------------------------------- main -------------------------------------

if __name__ == "__main__":
    batch = 2
    input_dim = 16
    reservoir_sizes = [32, 32]
    mlp_hidden_dims = [32]
    output_dim = 8

    key = jax.random.PRNGKey(0)
    key, kx = jax.random.split(key)
    x = jax.random.normal(kx, (batch, input_dim), jnp.float32)

    layers = make_params(key, input_dim, reservoir_sizes,
                         mlp_hidden_dims, output_dim)
    weights, biases, acts = prepare_params(layers)

    out = fused_forward(x, weights, biases, acts=acts, output_dim=output_dim)
    out = jax.block_until_ready(out)

    # Pure-JAX f32 reference (same math on the logical, unpadded weights).
    h = x
    for (w, b, act) in layers:
        h = h @ w.T + b
        if act == "tanh":
            h = jnp.tanh(h)
        elif act == "relu":
            h = jnp.maximum(h, 0.0)

    assert out.shape == (batch, output_dim)
    # bf16 weights/activations (f32 accumulate) -> loosened tolerance.
    assert jnp.allclose(out, h, atol=3e-2, rtol=3e-2), "mismatch vs reference"

    print("KERNEL_OK")
</pallas_src>

<mosaic_0001>
module attributes {stable_mosaic.version = 11 : i64} {
  func.func @_fused_net_kernel(%arg0: i32, %arg1: memref<8x128xbf16, #tpu.memory_space<vmem>>, %arg2: memref<128x128xbf16, #tpu.memory_space<vmem>>, %arg3: memref<1x128xf32, #tpu.memory_space<vmem>>, %arg4: memref<128x128xbf16, #tpu.memory_space<vmem>>, %arg5: memref<1x128xf32, #tpu.memory_space<vmem>>, %arg6: memref<128x128xbf16, #tpu.memory_space<vmem>>, %arg7: memref<1x128xf32, #tpu.memory_space<vmem>>, %arg8: memref<128x128xbf16, #tpu.memory_space<vmem>>, %arg9: memref<1x128xf32, #tpu.memory_space<vmem>>, %arg10: memref<8x128xf32, #tpu.memory_space<vmem>>) attributes {dimension_semantics = [#tpu.dimension_semantics<parallel>], iteration_bounds = array<i64: 1>, scalar_prefetch = 0 : i64, scratch_operands = 0 : i64, tpu.core_type = #tpu.core_type<tc>, window_params = [{transform_indices = @transform_0, window_bounds = array<i64: 8, 128>}, {pipeline_mode = #tpu.pipeline_mode<synchronous>, transform_indices = @transform_1, window_bounds = array<i64: 128, 128>}, {pipeline_mode = #tpu.pipeline_mode<synchronous>, transform_indices = @transform_2, window_bounds = array<i64: 1, 128>}, {pipeline_mode = #tpu.pipeline_mode<synchronous>, transform_indices = @transform_3, window_bounds = array<i64: 128, 128>}, {pipeline_mode = #tpu.pipeline_mode<synchronous>, transform_indices = @transform_4, window_bounds = array<i64: 1, 128>}, {pipeline_mode = #tpu.pipeline_mode<synchronous>, transform_indices = @transform_5, window_bounds = array<i64: 128, 128>}, {pipeline_mode = #tpu.pipeline_mode<synchronous>, transform_indices = @transform_6, window_bounds = array<i64: 1, 128>}, {pipeline_mode = #tpu.pipeline_mode<synchronous>, transform_indices = @transform_7, window_bounds = array<i64: 128, 128>}, {pipeline_mode = #tpu.pipeline_mode<synchronous>, transform_indices = @transform_8, window_bounds = array<i64: 1, 128>}, {transform_indices = @transform_9, window_bounds = array<i64: 8, 128>}]} {
    %c0 = arith.constant 0 : index
    %c0_0 = arith.constant 0 : index
    %0 = vector.load %arg1[%c0, %c0_0] : memref<8x128xbf16, #tpu.memory_space<vmem>>, vector<8x128xbf16>
    %c0_1 = arith.constant 0 : index
    %c0_2 = arith.constant 0 : index
    %1 = vector.load %arg2[%c0_1, %c0_2] : memref<128x128xbf16, #tpu.memory_space<vmem>>, vector<128x128xbf16>
    %c0_3 = arith.constant 0 : index
    %c0_4 = arith.constant 0 : index
    %2 = vector.load %arg3[%c0_3, %c0_4] : memref<1x128xf32, #tpu.memory_space<vmem>>, vector<1x128xf32>
    %cst = arith.constant dense<0.000000e+00> : vector<8x128xf32>
    %3 = tpu.matmul %0, %1, %cst {dimension_numbers = #tpu.dot_dimension_numbers<[1], [0], [0], [1], [0, 0, 1, 1], [], []>} : vector<8x128xbf16>, vector<128x128xbf16>, vector<8x128xf32> -> vector<8x128xf32>
    %4 = vector.broadcast %2 : vector<1x128xf32> to vector<8x128xf32>
    %5 = arith.addf %3, %4 : vector<8x128xf32>
    %6 = math.tanh %5 : vector<8x128xf32>
    %7 = arith.truncf %6 : vector<8x128xf32> to vector<8x128xbf16>
    %c0_5 = arith.constant 0 : index
    %c0_6 = arith.constant 0 : index
    %8 = vector.load %arg4[%c0_5, %c0_6] : memref<128x128xbf16, #tpu.memory_space<vmem>>, vector<128x128xbf16>
    %c0_7 = arith.constant 0 : index
    %c0_8 = arith.constant 0 : index
    %9 = vector.load %arg5[%c0_7, %c0_8] : memref<1x128xf32, #tpu.memory_space<vmem>>, vector<1x128xf32>
    %cst_9 = arith.constant dense<0.000000e+00> : vector<8x128xf32>
    %10 = tpu.matmul %7, %8, %cst_9 {dimension_numbers = #tpu.dot_dimension_numbers<[1], [0], [0], [1], [0, 0, 1, 1], [], []>} : vector<8x128xbf16>, vector<128x128xbf16>, vector<8x128xf32> -> vector<8x128xf32>
    %11 = vector.broadcast %9 : vector<1x128xf32> to vector<8x128xf32>
    %12 = arith.addf %10, %11 : vector<8x128xf32>
    %13 = math.tanh %12 : vector<8x128xf32>
    %14 = arith.truncf %13 : vector<8x128xf32> to vector<8x128xbf16>
    %c0_10 = arith.constant 0 : index
    %c0_11 = arith.constant 0 : index
    %15 = vector.load %arg6[%c0_10, %c0_11] : memref<128x128xbf16, #tpu.memory_space<vmem>>, vector<128x128xbf16>
    %c0_12 = arith.constant 0 : index
    %c0_13 = arith.constant 0 : index
    %16 = vector.load %arg7[%c0_12, %c0_13] : memref<1x128xf32, #tpu.memory_space<vmem>>, vector<1x128xf32>
    %cst_14 = arith.constant dense<0.000000e+00> : vector<8x128xf32>
    %17 = tpu.matmul %14, %15, %cst_14 {dimension_numbers = #tpu.dot_dimension_numbers<[1], [0], [0], [1], [0, 0, 1, 1], [], []>} : vector<8x128xbf16>, vector<128x128xbf16>, vector<8x128xf32> -> vector<8x128xf32>
    %18 = vector.broadcast %16 : vector<1x128xf32> to vector<8x128xf32>
    %19 = arith.addf %17, %18 : vector<8x128xf32>
    %cst_15 = arith.constant 0.000000e+00 : f32
    %20 = vector.broadcast %cst_15 : f32 to vector<8x128xf32>
    %21 = arith.maximumf %19, %20 : vector<8x128xf32>
    %22 = arith.truncf %21 : vector<8x128xf32> to vector<8x128xbf16>
    %c0_16 = arith.constant 0 : index
    %c0_17 = arith.constant 0 : index
    %23 = vector.load %arg8[%c0_16, %c0_17] : memref<128x128xbf16, #tpu.memory_space<vmem>>, vector<128x128xbf16>
    %c0_18 = arith.constant 0 : index
    %c0_19 = arith.constant 0 : index
    %24 = vector.load %arg9[%c0_18, %c0_19] : memref<1x128xf32, #tpu.memory_space<vmem>>, vector<1x128xf32>
    %cst_20 = arith.constant dense<0.000000e+00> : vector<8x128xf32>
    %25 = tpu.matmul %22, %23, %cst_20 {dimension_numbers = #tpu.dot_dimension_numbers<[1], [0], [0], [1], [0, 0, 1, 1], [], []>} : vector<8x128xbf16>, vector<128x128xbf16>, vector<8x128xf32> -> vector<8x128xf32>
    %26 = vector.broadcast %24 : vector<1x128xf32> to vector<8x128xf32>
    %27 = arith.addf %25, %26 : vector<8x128xf32>
    %c0_21 = arith.constant 0 : index
    %c0_22 = arith.constant 0 : index
    %28 = vector.load %arg10[%c0_21, %c0_22] : memref<8x128xf32, #tpu.memory_space<vmem>>, vector<8x128xf32>
    tpu.vector_store %arg10[%c0_21, %c0_22], %27 {strides = array<i32>} : memref<8x128xf32, #tpu.memory_space<vmem>>, vector<8x128xf32>,
    return
  }
  func.func @transform_0(%arg0: i32) -> (i32, i32) {
    %c0_i32 = arith.constant 0 : i32
    %c0_i32_0 = arith.constant 0 : i32
    return %arg0, %c0_i32 : i32, i32
  }
  func.func @transform_1(%arg0: i32) -> (i32, i32) {
    %c0_i32 = arith.constant 0 : i32
    %c0_i32_0 = arith.constant 0 : i32
    %c0_i32_1 = arith.constant 0 : i32
    return %c0_i32, %c0_i32_0 : i32, i32
  }
  func.func @transform_2(%arg0: i32) -> (i32, i32) {
    %c0_i32 = arith.constant 0 : i32
    %c0_i32_0 = arith.constant 0 : i32
    %c0_i32_1 = arith.constant 0 : i32
    return %c0_i32, %c0_i32_0 : i32, i32
  }
  func.func @transform_3(%arg0: i32) -> (i32, i32) {
    %c0_i32 = arith.constant 0 : i32
    %c0_i32_0 = arith.constant 0 : i32
    %c0_i32_1 = arith.constant 0 : i32
    return %c0_i32, %c0_i32_0 : i32, i32
  }
  func.func @transform_4(%arg0: i32) -> (i32, i32) {
    %c0_i32 = arith.constant 0 : i32
    %c0_i32_0 = arith.constant 0 : i32
    %c0_i32_1 = arith.constant 0 : i32
    return %c0_i32, %c0_i32_0 : i32, i32
  }
  func.func @transform_5(%arg0: i32) -> (i32, i32) {
    %c0_i32 = arith.constant 0 : i32
    %c0_i32_0 = arith.constant 0 : i32
    %c0_i32_1 = arith.constant 0 : i32
    return %c0_i32, %c0_i32_0 : i32, i32
  }
  func.func @transform_6(%arg0: i32) -> (i32, i32) {
    %c0_i32 = arith.constant 0 : i32
    %c0_i32_0 = arith.constant 0 : i32
    %c0_i32_1 = arith.constant 0 : i32
    return %c0_i32, %c0_i32_0 : i32, i32
  }
  func.func @transform_7(%arg0: i32) -> (i32, i32) {
    %c0_i32 = arith.constant 0 : i32
    %c0_i32_0 = arith.constant 0 : i32
    %c0_i32_1 = arith.constant 0 : i32
    return %c0_i32, %c0_i32_0 : i32, i32
  }
  func.func @transform_8(%arg0: i32) -> (i32, i32) {
    %c0_i32 = arith.constant 0 : i32
    %c0_i32_0 = arith.constant 0 : i32
    %c0_i32_1 = arith.constant 0 : i32
    return %c0_i32, %c0_i32_0 : i32, i32
  }
  func.func @transform_9(%arg0: i32) -> (i32, i32) {
    %c0_i32 = arith.constant 0 : i32
    %c0_i32_0 = arith.constant 0 : i32
    return %arg0, %c0_i32 : i32, i32
  }
}

</mosaic_0001>

<bundles_post_ra>
// kernel: fused_forward.1
= control target key start
LH: loop header
LB: loop body
LE: loop exit
PB: predicated region body
PF: predicated region fallthrough
CT: control target
= control target key end

     0   :  { %14 = vsyncpa [#allocation3], 0  ;;  %s1027_s0 = inlined_call_operand.vmem [shape: bf16[8,128], index: 0, kind: input, shape index: {}]   ;;  %s1028_s1 = inlined_call_operand.hbm [shape: bf16[128,128], index: 1, kind: input, shape index: {}]   ;;  %s1029_s2 = inlined_call_operand.vmem [shape: f32[1,128], index: 2, kind: input, shape index: {}]   ;;  %s1030_s3 = inlined_call_operand.hbm [shape: bf16[128,128], index: 3, kind: input, shape index: {}]   ;;  %s1031_s4 = inlined_call_operand.vmem [shape: f32[1,128], index: 4, kind: input, shape index: {}]   ;;  %s1032_s5 = inlined_call_operand.hbm [shape: bf16[128,128], index: 5, kind: input, shape index: {}]   ;;  %s1033_s6 = inlined_call_operand.vmem [shape: f32[1,128], index: 6, kind: input, shape index: {}]   ;;  %s1034_s7 = inlined_call_operand.hbm [shape: bf16[128,128], index: 7, kind: input, shape index: {}]   ;;  %s1035_s8 = inlined_call_operand.vmem [shape: f32[1,128], index: 8, kind: input, shape index: {}]   ;;  %s1036_s9 = inlined_call_operand.vmem [shape: f32[8,128], index: 9, kind: output, shape index: {}]  }
   0x1   :  { %15 = vsyncpa [#allocation5], 0 }
   0x2   :  { %16 = vsyncpa [#allocation8], 0  ;;  %s837_s30 = smov [#allocation4]   ;;  %s838_s11 = smov [#allocation2]  }
   0x3   :  { %s38_s10 = sshll.u32 %s837_s30, 4  ;;  %s24_s12 = sshll.u32 %s838_s11, 4  ;;  %s39_s10 = int_to_ptr.vmem [resolvable:$true] %s38_s10  ;;  %s895_s12 = int_to_ptr.vmem [resolvable:$true] %s24_s12 }
   0x4   :  { %s743_s15 = scalar_lea.hbm %s1030_s3, 1024 }
   0x5   :  { %p744_p0 = scmp.ne.s32.totalorder %s1030_s3, %s743_s15  ;;  %p747_p1 = scmp.lt.u32.totalorder %s743_s15, %s1030_s3 }
   0x7   :  { %p749_p2 = pnand %p747_p1, %p744_p0 }
   0x9   :  { %752 = shalt.err (!%p749_p2)
}
   0xa   :  { %s753_s20 = scalar_lea.vmem %s39_s10, 1024  ;;  %p758_p4 = scmp.lt.s32.totalorder %s39_s10, %s39_s10 }
   0xb   :  { %p754_p3 = scmp.ne.s32.totalorder %s39_s10, %s753_s20  ;;  %p759_p5 = scmp.lt.s32.totalorder %s753_s20, %s753_s20 }
   0xd   :  { %p760_p6 = por %p759_p5, %p758_p4 }
   0xf   :  { %p761_p7 = pnand %p760_p6, %p754_p3 }
  0x11   :  { %764 = shalt.err (!%p761_p7)
}
  0x12   :  { %s839_s21 = smov 64   ;;  %s840_s22 = smov 4  }
  0x13   :  { %44 = dma.hbm_to_vmem [thread:$0]  %s1030_s3, 1024, %s39_s10, [#allocation5], %s839_s21, %s839_s21, %s840_s22  }
  0x14   :  { %s765_s27 = scalar_lea.hbm %s1028_s1, 1024 }
  0x15   :  { %p766_p8 = scmp.ne.s32.totalorder %s1028_s1, %s765_s27  ;;  %p769_p9 = scmp.lt.u32.totalorder %s765_s27, %s1028_s1 }
  0x17   :  { %p771_p10 = pnand %p769_p9, %p766_p8 }
  0x19   :  { %774 = shalt.err (!%p771_p10)
}
  0x1a   :  { %s775_s13 = scalar_lea.vmem %s895_s12, 1024  ;;  %p780_p12 = scmp.lt.s32.totalorder %s895_s12, %s895_s12 }
  0x1b   :  { %p776_p11 = scmp.ne.s32.totalorder %s895_s12, %s775_s13  ;;  %p781_p13 = scmp.lt.s32.totalorder %s775_s13, %s775_s13 }
  0x1d   :  { %p782_p0 = por %p781_p13, %p780_p12 }
  0x1f   :  { %p783_p1 = pnand %p782_p0, %p776_p11 }
  0x21   :  { %786 = shalt.err (!%p783_p1)
}
  0x22   :  { %30 = dma.hbm_to_vmem [thread:$0]  %s1028_s1, 1024, %s895_s12, [#allocation3], %s839_s21, %s839_s21, %s840_s22  }
  0x23   :  { %s841_s14 = smov [#allocation6]   ;;  %s842_s16 = smov [#allocation7]  }
  0x24   :  { %s52_s15 = sshll.u32 %s841_s14, 4  ;;  %s66_s17 = sshll.u32 %s842_s16, 4  ;;  %s53_s15 = int_to_ptr.vmem [resolvable:$true] %s52_s15  ;;  %s932_s17 = int_to_ptr.vmem [resolvable:$true] %s66_s17 }
  0x25   :  { %s787_s20 = scalar_lea.hbm %s1032_s5, 1024 }
  0x26   :  { %p788_p2 = scmp.ne.s32.totalorder %s1032_s5, %s787_s20  ;;  %p791_p3 = scmp.lt.u32.totalorder %s787_s20, %s1032_s5 }
  0x28   :  { %p793_p4 = pnand %p791_p3, %p788_p2 }
  0x2a   :  { %796 = shalt.err (!%p793_p4)
}
  0x2b   :  { %s797_s1 = scalar_lea.vmem %s53_s15, 1024  ;;  %p802_p6 = scmp.lt.s32.totalorder %s53_s15, %s53_s15 }
  0x2c   :  { %p798_p5 = scmp.ne.s32.totalorder %s53_s15, %s797_s1  ;;  %p803_p7 = scmp.lt.s32.totalorder %s797_s1, %s797_s1 }
  0x2e   :  { %p804_p8 = por %p803_p7, %p802_p6 }
  0x30   :  { %p805_p9 = pnand %p804_p8, %p798_p5 }
  0x32   :  { %808 = shalt.err (!%p805_p9)
}
  0x33   :  { %58 = dma.hbm_to_vmem [thread:$0]  %s1032_s5, 1024, %s53_s15, [#allocation5], %s839_s21, %s839_s21, %s840_s22  }
  0x34   :  { %s809_s30 = scalar_lea.hbm %s1034_s7, 1024 }
  0x35   :  { %p810_p10 = scmp.ne.s32.totalorder %s1034_s7, %s809_s30  ;;  %p813_p11 = scmp.lt.u32.totalorder %s809_s30, %s1034_s7 }
  0x37   :  { %p815_p12 = pnand %p813_p11, %p810_p10 }
  0x39   :  { %818 = shalt.err (!%p815_p12)
}
  0x3a   :  { %s819_s14 = scalar_lea.vmem %s932_s17, 1024  ;;  %p824_p0 = scmp.lt.s32.totalorder %s932_s17, %s932_s17 }
  0x3b   :  { %p820_p13 = scmp.ne.s32.totalorder %s932_s17, %s819_s14  ;;  %p825_p1 = scmp.lt.s32.totalorder %s819_s14, %s819_s14 }
  0x3d   :  { %p826_p2 = por %p825_p1, %p824_p0 }
  0x3f   :  { %p827_p3 = pnand %p826_p2, %p820_p13 }
  0x41   :  { %830 = shalt.err (!%p827_p3)
}
  0x42   :  { %72 = dma.hbm_to_vmem [thread:$0]  %s1034_s7, 1024, %s932_s17, [#allocation8], %s839_s21, %s839_s21, %s840_s22  }
  0x43   :  { %831 = dma.done.wait [#allocation3], 1024  }
  0x44   :  { %832 = vsyncadd [#allocation3], 4294966272 }
  0x45   :  { %833 = dma.done.wait [#allocation5], 2048  }
  0x46   :  { %834 = vsyncadd [#allocation5], 4294965248 }
  0x47   :  { %835 = dma.done.wait [#allocation8], 1024  }
  0x48   :  { %836 = vsyncadd [#allocation8], 4294966272  ;;  %v843_v0 = vmov 0.0   ;;  %vm844_vm0 = vmmov 0   ;;  %v707_v1 = vld [vmem:[#allocation2] sm:$0xff]   ;;  %v708_v2 = vld [vmem:[#allocation2 + $0x8] sm:$0xff]  }
  0x49   :  { %619 = vmatprep.subr.bf16.mxu0 %v843_v0  ;;  %635 = vmatprep.mubr.msk.bf16.mxu0 %vm844_vm0, %v843_v0  ;;  %v709_v3 = vld [vmem:[#allocation2 + $0x10] sm:$0xff]   ;;  %v715_v4 = vld [vmem:[#allocation4] sm:$0xff]   ;;  %v710_v5 = vld [vmem:[#allocation2 + $0x18] sm:$0xff]  }
  0x4a   :  { %639 = vmatprep.subr.bf16.mxu1 %v843_v0  ;;  %655 = vmatprep.mubr.msk.bf16.mxu1 %vm844_vm0, %v843_v0  ;;  %v716_v6 = vld [vmem:[#allocation4 + $0x8] sm:$0xff]   ;;  %v711_v7 = vld [vmem:[#allocation2 + $0x20] sm:$0xff]   ;;  %v717_v8 = vld [vmem:[#allocation4 + $0x10] sm:$0xff]  }
  0x4b   :  { %620 = vmatpush3.bf16.msra.mxu0 %v707_v1  ;;  %640 = vmatpush3.bf16.msra.mxu1 %v715_v4  ;;  %v712_v9 = vld [vmem:[#allocation2 + $0x28] sm:$0xff]   ;;  %v718_v10 = vld [vmem:[#allocation4 + $0x18] sm:$0xff]   ;;  %v713_v11 = vld [vmem:[#allocation2 + $0x30] sm:$0xff]  }
  0x4c   :  { %621 = vmatprep.subr.bf16.mxu0 %v843_v0  ;;  %641 = vmatprep.subr.bf16.mxu1 %v843_v0  ;;  %v714_v12 = vld [vmem:[#allocation2 + $0x38] sm:$0xff]   ;;  %v88_v13 = vld [vmem:[%s1027_s0] sm:$0xf]  ;;  %v720_v15 = vld [vmem:[#allocation4 + $0x28] sm:$0xff]  }
  0x4d   :  { %v719_v14 = vld [vmem:[#allocation4 + $0x20] sm:$0xff]   ;;  %v721_v16 = vld [vmem:[#allocation4 + $0x30] sm:$0xff]   ;;  %v722_v17 = vld [vmem:[#allocation4 + $0x38] sm:$0xff]  }
  0x4e   :  { %v723_v18 = vld [vmem:[#allocation6] sm:$0xff]   ;;  %v724_v19 = vld [vmem:[#allocation6 + $0x8] sm:$0xff]   ;;  %v725_v20 = vld [vmem:[#allocation6 + $0x10] sm:$0xff]  }
  0x4f   :  { %622 = vmatpush3.bf16.msra.mxu0 %v708_v2  ;;  %642 = vmatpush3.bf16.msra.mxu1 %v716_v6  ;;  %v726_v21 = vld [vmem:[#allocation6 + $0x18] sm:$0xff]   ;;  %v547_v22 = vld [vmem:[%s1029_s2] ss:$0 sm:$0xff]  ;;  %v728_v31 = vld [vmem:[#allocation6 + $0x28] sm:$0xff]  }
  0x50   :  { %623 = vmatprep.subr.bf16.mxu0 %v843_v0  ;;  %643 = vmatprep.subr.bf16.mxu1 %v843_v0  ;;  %v727_v30 = vld [vmem:[#allocation6 + $0x20] sm:$0xff]   ;;  %v729_v32 = vld [vmem:[#allocation6 + $0x30] sm:$0xff]   ;;  %v730_v33 = vld [vmem:[#allocation6 + $0x38] sm:$0xff]  }
  0x51   :  { %v731_v34 = vld [vmem:[#allocation7] sm:$0xff]   ;;  %v732_v35 = vld [vmem:[#allocation7 + $0x8] sm:$0xff]   ;;  %v733_v36 = vld [vmem:[#allocation7 + $0x10] sm:$0xff]  }
  0x52   :  { %v734_v37 = vld [vmem:[#allocation7 + $0x18] sm:$0xff]   ;;  %v735_v38 = vld [vmem:[#allocation7 + $0x20] sm:$0xff]   ;;  %v736_v39 = vld [vmem:[#allocation7 + $0x28] sm:$0xff]  }
  0x53   :  { %624 = vmatpush3.bf16.msra.mxu0 %v709_v3  ;;  %644 = vmatpush3.bf16.msra.mxu1 %v717_v8  ;;  %v556_v40 = vld [vmem:[%s1031_s4] ss:$0 sm:$0xff]  ;;  %v737_v48 = vld [vmem:[#allocation7 + $0x30] sm:$0xff]   ;;  %v738_v49 = vld [vmem:[#allocation7 + $0x38] sm:$0xff]  }
  0x54   :  { %625 = vmatprep.subr.bf16.mxu0 %v843_v0  ;;  %645 = vmatprep.subr.bf16.mxu1 %v843_v0  ;;  %v565_v50 = vld [vmem:[%s1033_s6] ss:$0 sm:$0xff] }
  0x55   :  { %v574_v58 = vld [vmem:[%s1035_s8] ss:$0 sm:$0xff] }
  0x57   :  { %626 = vmatpush3.bf16.msra.mxu0 %v710_v5  ;;  %646 = vmatpush3.bf16.msra.mxu1 %v718_v10 }
  0x58   :  { %627 = vmatprep.subr.bf16.mxu0 %v843_v0  ;;  %647 = vmatprep.subr.bf16.mxu1 %v843_v0 }
  0x5b   :  { %628 = vmatpush3.bf16.msra.mxu0 %v711_v7  ;;  %648 = vmatpush3.bf16.msra.mxu1 %v719_v14 }
  0x5c   :  { %629 = vmatprep.subr.bf16.mxu0 %v843_v0  ;;  %649 = vmatprep.subr.bf16.mxu1 %v843_v0 }
  0x5f   :  { %630 = vmatpush3.bf16.msra.mxu0 %v712_v9  ;;  %650 = vmatpush3.bf16.msra.mxu1 %v720_v15 }
  0x60   :  { %631 = vmatprep.subr.bf16.mxu0 %v843_v0  ;;  %651 = vmatprep.subr.bf16.mxu1 %v843_v0 }
  0x63   :  { %632 = vmatpush3.bf16.msra.mxu0 %v713_v11  ;;  %652 = vmatpush3.bf16.msra.mxu1 %v721_v16 }
  0x64   :  { %633 = vmatprep.subr.bf16.mxu0 %v843_v0  ;;  %653 = vmatprep.subr.bf16.mxu1 %v843_v0 }
  0x67   :  { %634 = vmatpush3.bf16.msra.mxu0 %v714_v12  ;;  %654 = vmatpush3.bf16.msra.mxu1 %v722_v17 }
  0x68   :  { %659 = vmatprep.subr.bf16.mxu0 %v843_v0  ;;  %679 = vmatprep.subr.bf16.mxu1 %v843_v0 }
  0x6a   :  { %636 = vmatmul.mubr.bf16.vlgmr.msra.gmra.mrb[0].mxu0 %v88_v13 }
  0x6b   :  { %675 = vmatprep.mubr.msk.bf16.mxu0 %vm844_vm0, %v843_v0  ;;  %660 = vmatpush3.bf16.msra.mxu0 %v723_v18 }
  0x6c   :  { %661 = vmatprep.subr.bf16.mxu0 %v843_v0 }
  0x6f   :  { %662 = vmatpush3.bf16.msra.mxu0 %v724_v19 }
  0x70   :  { %663 = vmatprep.subr.bf16.mxu0 %v843_v0 }
  0x73   :  { %664 = vmatpush3.bf16.msra.mxu0 %v725_v20 }
  0x74   :  { %665 = vmatprep.subr.bf16.mxu0 %v843_v0 }
  0x77   :  { %666 = vmatpush3.bf16.msra.mxu0 %v726_v21 }
  0x78   :  { %667 = vmatprep.subr.bf16.mxu0 %v843_v0 }
  0x7b   :  { %668 = vmatpush3.bf16.msra.mxu0 %v727_v30 }
  0x7c   :  { %669 = vmatprep.subr.bf16.mxu0 %v843_v0 }
  0x7f   :  { %670 = vmatpush3.bf16.msra.mxu0 %v728_v31 }
  0x80   :  { %671 = vmatprep.subr.bf16.mxu0 %v843_v0 }
  0x83   :  { %672 = vmatpush3.bf16.msra.mxu0 %v729_v32 }
  0x84   :  { %673 = vmatprep.subr.bf16.mxu0 %v843_v0 }
  0x87   :  { %674 = vmatpush3.bf16.msra.mxu0 %v730_v33 }
 0x13d   :  { %v194_v23 = vpop.f32.mrb[0].mxu0 }
 0x13e   :  { %v195_v24 = vadd.f32 %v547_v22, %v194_v23  ;;  %v637_v25 = vpop.f32.mrb[1].mxu0 }
 0x13f   :  { %v197_v26 = vpop.f32.mrb[2].mxu0 }
 0x140   :  { %739 = vtanh.f32 %v195_v24  ;;  %v638_v27 = vpop.f32.mrb[3].mxu0 }
 0x14a   :  { %v740_v28 = vpop.eup %739 }
 0x14b   :  { %v201_v29 = vpack.c.bf16 %v740_v28, %v740_v28 }
 0x14d   :  { %656 = vmatmul.mubr.bf16.vlgmr.msra.gmra.mrb[0].mxu1 %v201_v29 }
 0x14e   :  { %695 = vmatprep.mubr.msk.bf16.mxu1 %vm844_vm0, %v843_v0  ;;  %680 = vmatpush3.bf16.msra.mxu1 %v731_v34 }
 0x14f   :  { %681 = vmatprep.subr.bf16.mxu1 %v843_v0 }
 0x152   :  { %682 = vmatpush3.bf16.msra.mxu1 %v732_v35 }
 0x153   :  { %683 = vmatprep.subr.bf16.mxu1 %v843_v0 }
 0x156   :  { %684 = vmatpush3.bf16.msra.mxu1 %v733_v36 }
 0x157   :  { %685 = vmatprep.subr.bf16.mxu1 %v843_v0 }
 0x15a   :  { %686 = vmatpush3.bf16.msra.mxu1 %v734_v37 }
 0x15b   :  { %687 = vmatprep.subr.bf16.mxu1 %v843_v0 }
 0x15e   :  { %688 = vmatpush3.bf16.msra.mxu1 %v735_v38 }
 0x15f   :  { %689 = vmatprep.subr.bf16.mxu1 %v843_v0 }
 0x162   :  { %690 = vmatpush3.bf16.msra.mxu1 %v736_v39 }
 0x163   :  { %691 = vmatprep.subr.bf16.mxu1 %v843_v0 }
 0x166   :  { %692 = vmatpush3.bf16.msra.mxu1 %v737_v48 }
 0x167   :  { %693 = vmatprep.subr.bf16.mxu1 %v843_v0 }
 0x16a   :  { %694 = vmatpush3.bf16.msra.mxu1 %v738_v49 }
 0x220   :  { %v307_v41 = vpop.f32.mrb[0].mxu1 }
 0x221   :  { %v308_v42 = vadd.f32 %v556_v40, %v307_v41  ;;  %v657_v43 = vpop.f32.mrb[1].mxu1 }
 0x222   :  { %v310_v44 = vpop.f32.mrb[2].mxu1 }
 0x223   :  { %741 = vtanh.f32 %v308_v42  ;;  %v658_v45 = vpop.f32.mrb[3].mxu1 }
 0x22d   :  { %v742_v46 = vpop.eup %741 }
 0x22e   :  { %v314_v47 = vpack.c.bf16 %v742_v46, %v742_v46 }
 0x230   :  { %676 = vmatmul.mubr.bf16.vlgmr.msra.gmra.mrb[4].mxu0 %v314_v47 }
 0x303   :  { %v420_v51 = vpop.f32.mrb[4].mxu0 }
 0x304   :  { %v421_v52 = vadd.f32 %v565_v50, %v420_v51  ;;  %v677_v53 = vpop.f32.mrb[5].mxu0 }
 0x305   :  { %v423_v54 = vpop.f32.mrb[6].mxu0 }
 0x306   :  { %v426_v55 = vmax.f32 %v421_v52, 0.0  ;;  %v678_v56 = vpop.f32.mrb[7].mxu0 }
 0x308   :  { %v427_v57 = vpack.c.bf16 %v426_v55, %v426_v55 }
 0x30a   :  { %696 = vmatmul.mubr.bf16.vlgmr.msra.gmra.mrb[4].mxu1 %v427_v57 }
 0x3dd   :  { %v533_v59 = vpop.f32.mrb[4].mxu1 }
 0x3de   :  { %v534_v60 = vadd.f32 %v574_v58, %v533_v59  ;;  %v697_v61 = vpop.f32.mrb[5].mxu1 }
 0x3df   :  { %v536_v62 = vpop.f32.mrb[6].mxu1 }
 0x3e0   :  { %539 = vst [vmem:[%s1036_s9] sm:$0xff] %v534_v60  ;;  %v698_v63 = vpop.f32.mrb[7].mxu1 }
 0x3e1   :  { %544 = vsyncpa [#allocation3], 1 }
 0x3e2   :  { %545 = vsyncpa [#allocation5], 1 }
 0x3e3   :  { %546 = vsyncpa [#allocation8], 1 }

</bundles_post_ra>
